<compile_context>
chip_gen: v6e
topology: v6e:2x2x1
jax: 0.10.0
libtpu: 0.0.40
codegen_flags: <defaults>
</compile_context>

<pallas_src>
import functools
import math

import jax
import jax.numpy as jnp
from jax.experimental import pallas as pl
from jax.experimental.pallas import tpu as pltpu


def _build_pe_table(d_model: int, max_len: int) -> jnp.ndarray:
    """Replicates the PyTorch buffer `pe` (before unsqueeze/transpose):
    shape [max_len, d_model], pe[:, 0::2] = sin, pe[:, 1::2] = cos."""
    position = jnp.arange(max_len, dtype=jnp.float32)[:, None]          # [L, 1]
    div_term = jnp.exp(
        jnp.arange(0, d_model, 2, dtype=jnp.float32) * (-math.log(10000.0) / d_model)
    )                                                                    # [D/2]
    angles = position * div_term                                         # [L, D/2]
    pe = jnp.zeros((max_len, d_model), dtype=jnp.float32)
    pe = pe.at[:, 0::2].set(jnp.sin(angles))
    pe = pe.at[:, 1::2].set(jnp.cos(angles))
    return pe


def _pe_dropout_kernel(seed_ref, x_ref, pe_ref, o_ref, *, p: float, training: bool):
    # x_ref: [ts, B, D]   pe_ref: [ts, 1, D]   o_ref: [ts, B, D]
    # The (ts, 1, D) pe block broadcasts over the batch (sublane) axis in the
    # add itself — no explicit [:, None, :] relayout.
    y = x_ref[...] + pe_ref[...]

    if training and p > 0.0:
        ts, B, D = x_ref.shape
        shape = (ts, B, D)

        # Global element index (invariant to the tiling choice).
        s_idx = jax.lax.broadcasted_iota(jnp.int32, shape, 0)
        b_idx = jax.lax.broadcasted_iota(jnp.int32, shape, 1)
        d_idx = jax.lax.broadcasted_iota(jnp.int32, shape, 2)
        lin = (pl.program_id(0) * ts + s_idx) * (B * D) + b_idx * D + d_idx

        # Stateless counter-based RNG: lowbias32 finalizer of (index ^ f(seed)).
        # Pure VALU integer work, hidden under HBM stalls for this mem-bound op.
        seed = seed_ref[0].astype(jnp.uint32)
        h = lin.astype(jnp.uint32) ^ (seed * jnp.uint32(0x9E3779B9))
        h = (h ^ (h >> 16)) * jnp.uint32(0x7FEB352D)
        h = (h ^ (h >> 15)) * jnp.uint32(0x846CA68B)
        bits = h ^ (h >> 16)                              # uniform over [0, 2^32)

        # Drop iff bits falls in a fixed set of measure p.  Compare in int32
        # (bit-preserving reinterpret) against the threshold shifted into the
        # signed range: P(keep) = (2^32 - t) / 2^32 = 1 - p (up to 1/2^32).
        t = max(1, min(int(round(p * 4294967296.0)), 4294967295))
        keep = bits.astype(jnp.int32) >= jnp.int32(t - 2147483648)

        scale = jnp.float32(1.0 / (1.0 - p))              # inverted dropout
        y = jnp.where(keep, y * scale, jnp.zeros_like(y))

    o_ref[...] = y.astype(o_ref.dtype)


_TARGET_BLOCK_BYTES = 4 * 1024 * 1024   # ~4 MiB per x block; double-buffered
                                        # in+out stays well under the VMEM limit
                                        # on v5e/v6e/v7x.


def _choose_ts(S: int, B: int, D: int, itemsize: int) -> int:
    """Largest divisor of S whose [ts, B, D] block is <= ~_TARGET_BLOCK_BYTES."""
    rows = max(1, _TARGET_BLOCK_BYTES // max(1, B * D * itemsize))
    ts = int(min(S, rows))
    while S % ts:
        ts -= 1
    return ts


def positional_encoding_forward(x, pe_table, seed, *, p=0.1, training=True,
                                ts=None, donate_x=False):
    """x: [S, B, D], pe_table: [max_len, D] (float32), seed: python int."""
    S, B, D = x.shape
    max_len, d_model = pe_table.shape
    assert d_model == D and S <= max_len

    if ts is None:
        ts = _choose_ts(S, B, D, x.dtype.itemsize)
    assert S % ts == 0, f"seq tile {ts} must divide seq_len {S}"

    pe3d = pe_table.reshape(max_len, 1, D)            # free reshape; no host slice
    seed_arr = jnp.asarray([seed], dtype=jnp.int32)   # scalar-prefetch arg (SMEM)

    kernel = functools.partial(_pe_dropout_kernel, p=float(p), training=bool(training))

    grid_spec = pltpu.PrefetchScalarGridSpec(
        num_scalar_prefetch=1,
        grid=(S // ts,),
        in_specs=[
            pl.BlockSpec((ts, B, D), lambda i, seed: (i, 0, 0)),   # x
            pl.BlockSpec((ts, 1, D), lambda i, seed: (i, 0, 0)),   # pe (broadcast over B)
        ],
        out_specs=pl.BlockSpec((ts, B, D), lambda i, seed: (i, 0, 0)),
    )

    return pl.pallas_call(
        kernel,
        out_shape=jax.ShapeDtypeStruct((S, B, D), x.dtype),
        grid_spec=grid_spec,
        compiler_params=pltpu.CompilerParams(
            # Disjoint output tiles per step -> fully parallel seq axis
            # (lets v7x shard the grid across its 2 TensorCores).
            dimension_semantics=("parallel",),
            # Explicit scoped-VMEM cap: > v5e's 16 MiB default, < v7x's 64 MiB
            # physical VMEM; actual double-buffered footprint is ~16-18 MiB.
            vmem_limit_bytes=48 * 1024 * 1024,
        ),
        # Alias x with the output when the caller no longer needs x
        # (index 1 = x's position after the scalar-prefetch seed arg).
        input_output_aliases={1: 0} if donate_x else {},
    )(seed_arr, x, pe3d)


if __name__ == "__main__":
    # Small shapes consistent with the module's forward: [seq_len, batch, d_model]
    seq_len, batch, d_model = 8, 2, 32
    max_len = 64
    dropout_p = 0.1

    key = jax.random.PRNGKey(0)
    x = jax.random.normal(key, (seq_len, batch, d_model), dtype=jnp.float32)
    pe_table = _build_pe_table(d_model, max_len)
    ref = x + pe_table[:seq_len][:, None, :]

    # ---- eval mode (dropout is identity): check against pure-JAX reference ----
    y_eval = jax.block_until_ready(
        positional_encoding_forward(x, pe_table, seed=0, p=dropout_p, training=False))
    assert jnp.allclose(y_eval, ref, atol=1e-6, rtol=1e-6), "eval-mode mismatch"

    # ---- training mode (in-kernel counter-based dropout) ----
    y_train = jax.block_until_ready(
        positional_encoding_forward(x, pe_table, seed=1234, p=dropout_p, training=True))
    # Every element must be either 0 (dropped) or exactly ref / (1 - p) (kept).
    scaled = ref / (1.0 - dropout_p)
    dropped = y_train == 0.0
    kept_ok = jnp.abs(y_train - scaled) <= 1e-5 + 1e-5 * jnp.abs(scaled)
    assert bool(jnp.all(dropped | kept_ok)), "training-mode dropout value mismatch"
    drop_rate = float(jnp.mean(dropped.astype(jnp.float32)))
    assert 0.0 < drop_rate < 0.5, f"implausible drop rate {drop_rate}"

    print("KERNEL_OK")
</pallas_src>

<mosaic_0001>
module attributes {stable_mosaic.version = 11 : i64} {
  func.func @_pe_dropout_kernel(%arg0: i32, %arg1: memref<1xi32, #tpu.memory_space<smem>>, %arg2: memref<8x2x32xf32, #tpu.memory_space<vmem>>, %arg3: memref<8x1x32xf32, #tpu.memory_space<vmem>>, %arg4: memref<8x2x32xf32, #tpu.memory_space<vmem>>) attributes {dimension_semantics = [#tpu.dimension_semantics<parallel>], iteration_bounds = array<i64: 1>, scalar_prefetch = 1 : i64, scratch_operands = 0 : i64, tpu.core_type = #tpu.core_type<tc>, window_params = [{transform_indices = @transform_0, window_bounds = array<i64: 8, 2, 32>}, {transform_indices = @transform_1, window_bounds = array<i64: 8, 1, 32>}, {transform_indices = @transform_2, window_bounds = array<i64: 8, 2, 32>}]} {
    %c0 = arith.constant 0 : index
    %c0_0 = arith.constant 0 : index
    %c0_1 = arith.constant 0 : index
    %0 = vector.load %arg2[%c0, %c0_0, %c0_1] : memref<8x2x32xf32, #tpu.memory_space<vmem>>, vector<8x2x32xf32>
    %c0_2 = arith.constant 0 : index
    %c0_3 = arith.constant 0 : index
    %c0_4 = arith.constant 0 : index
    %1 = vector.load %arg3[%c0_2, %c0_3, %c0_4] : memref<8x1x32xf32, #tpu.memory_space<vmem>>, vector<8x1x32xf32>
    %2 = vector.broadcast %1 : vector<8x1x32xf32> to vector<8x2x32xf32>
    %3 = arith.addf %0, %2 : vector<8x2x32xf32>
    %c0_5 = arith.constant 0 : index
    %c0_6 = arith.constant 0 : index
    %c0_7 = arith.constant 0 : index
    %4 = vector.load %arg4[%c0_5, %c0_6, %c0_7] : memref<8x2x32xf32, #tpu.memory_space<vmem>>, vector<8x2x32xf32>
    tpu.vector_store %arg4[%c0_5, %c0_6, %c0_7], %3 {strides = array<i32>} : memref<8x2x32xf32, #tpu.memory_space<vmem>>, vector<8x2x32xf32>,
    return
  }
  func.func @transform_0(%arg0: i32, %arg1: memref<1xi32, #tpu.memory_space<smem>>) -> (i32, i32, i32) {
    %c0_i32 = arith.constant 0 : i32
    %c0_i32_0 = arith.constant 0 : i32
    %c0_i32_1 = arith.constant 0 : i32
    return %arg0, %c0_i32, %c0_i32_0 : i32, i32, i32
  }
  func.func @transform_1(%arg0: i32, %arg1: memref<1xi32, #tpu.memory_space<smem>>) -> (i32, i32, i32) {
    %c0_i32 = arith.constant 0 : i32
    %c0_i32_0 = arith.constant 0 : i32
    %c0_i32_1 = arith.constant 0 : i32
    return %arg0, %c0_i32, %c0_i32_0 : i32, i32, i32
  }
  func.func @transform_2(%arg0: i32, %arg1: memref<1xi32, #tpu.memory_space<smem>>) -> (i32, i32, i32) {
    %c0_i32 = arith.constant 0 : i32
    %c0_i32_0 = arith.constant 0 : i32
    %c0_i32_1 = arith.constant 0 : i32
    return %arg0, %c0_i32, %c0_i32_0 : i32, i32, i32
  }
}

</mosaic_0001>

<bundles_post_ra>
// kernel: tpu_custom_call.1
= control target key start
LH: loop header
LB: loop body
LE: loop exit
PB: predicated region body
PF: predicated region fallthrough
CT: control target
= control target key end

     0   :  { %vm86_vm0 = vcmask 254976   ;;  %s226_s0 = inlined_call_operand.<no memory space> [shape: s32[1], index: 0, kind: input, shape index: {}]   ;;  %s227_s1 = inlined_call_operand.vmem [shape: f32[8,2,32], index: 1, kind: input, shape index: {}]   ;;  %s228_s2 = inlined_call_operand.vmem [shape: f32[64,1,32], index: 2, kind: input, shape index: {}]   ;;  %s229_s3 = inlined_call_operand.hbm [shape: f32[8,2,32], index: 3, kind: output, shape index: {}]  }
   0x1   :  { %v14_v0 = vld [vmem:[%s227_s1] sm:$0x3]  ;;  %v15_v3 = vld [vmem:[%s227_s1 + $0x2] sm:$0x3]  ;;  %v16_v5 = vld [vmem:[%s227_s1 + $0x4] sm:$0x3] }
   0x2   :  { %v111_v1 = vld [vmem:[%s228_s2] ss:$0 sm:$0xff]  ;;  %v112_v4 = vld [vmem:[%s228_s2 + $0x1] ss:$0 sm:$0xff]  ;;  %v113_v7 = vld [vmem:[%s228_s2 + $0x2] ss:$0 sm:$0xff] }
   0x3   :  { %v78_v2 = vadd.f32 %v111_v1, %v14_v0  ;;  %v79_v6 = vadd.f32 %v112_v4, %v15_v3  ;;  %v17_v8 = vld [vmem:[%s227_s1 + $0x6] sm:$0x3]  ;;  %v114_v9 = vld [vmem:[%s228_s2 + $0x3] ss:$0 sm:$0xff]  ;;  %v80_v10 = vadd.f32 %v113_v7, %v16_v5  ;;  %v18_v12 = vld [vmem:[%s227_s1 + $0x8] sm:$0x3] }
   0x4   :  { %v81_v11 = vadd.f32 %v114_v9, %v17_v8  ;;  %v115_v13 = vld [vmem:[%s228_s2 + $0x4] ss:$0 sm:$0xff]  ;;  %v19_v14 = vld [vmem:[%s227_s1 + $0xa] sm:$0x3]  ;;  %v116_v16 = vld [vmem:[%s228_s2 + $0x5] ss:$0 sm:$0xff] }
   0x5   :  { %87 = vst.msk [vmem:[#allocation4] sm:$0x3] %vm86_vm0, %v78_v2  ;;  %88 = vst.msk [vmem:[#allocation4 + $0x2] sm:$0x3] %vm86_vm0, %v79_v6  ;;  %v82_v15 = vadd.f32 %v115_v13, %v18_v12  ;;  %v20_v17 = vld [vmem:[%s227_s1 + $0xc] sm:$0x3]  ;;  %v83_v19 = vadd.f32 %v116_v16, %v19_v14 }
   0x6   :  { %v117_v18 = vld [vmem:[%s228_s2 + $0x6] ss:$0 sm:$0xff]  ;;  %89 = vst.msk [vmem:[#allocation4 + $0x4] sm:$0x3] %vm86_vm0, %v80_v10  ;;  %90 = vst.msk [vmem:[#allocation4 + $0x6] sm:$0x3] %vm86_vm0, %v81_v11 }
   0x7   :  { %v84_v20 = vadd.f32 %v117_v18, %v20_v17  ;;  %v21_v21 = vld [vmem:[%s227_s1 + $0xe] sm:$0x3]  ;;  %v118_v22 = vld [vmem:[%s228_s2 + $0x7] ss:$0 sm:$0xff] }
   0x8   :  { %9 = vsyncpa [#allocation5], 0  ;;  %91 = vst.msk [vmem:[#allocation4 + $0x8] sm:$0x3] %vm86_vm0, %v82_v15  ;;  %v85_v23 = vadd.f32 %v118_v22, %v21_v21  ;;  %s144_s0 = smov [#allocation4]  }
   0x9   :  { %s100_s16 = sshll.u32 %s144_s0, 4  ;;  %92 = vst.msk [vmem:[#allocation4 + $0xa] sm:$0x3] %vm86_vm0, %v83_v19  ;;  %93 = vst.msk [vmem:[#allocation4 + $0xc] sm:$0x3] %vm86_vm0, %v84_v20  ;;  %s101_s16 = int_to_ptr.vmem [resolvable:$true] %s100_s16 }
   0xa   :  { %94 = vst.msk [vmem:[#allocation4 + $0xe] sm:$0x3] %vm86_vm0, %v85_v23  ;;  %s122_s17 = scalar_lea.vmem %s101_s16, 256  ;;  %p127_p1 = scmp.lt.s32.totalorder %s101_s16, %s101_s16 }
   0xb   :  { %p123_p0 = scmp.ne.s32.totalorder %s101_s16, %s122_s17  ;;  %p128_p2 = scmp.lt.s32.totalorder %s122_s17, %s122_s17 }
   0xd   :  { %p129_p3 = por %p128_p2, %p127_p1 }
   0xf   :  { %p130_p4 = pnand %p129_p3, %p123_p0 }
  0x11   :  { %133 = shalt.err (!%p130_p4)
}
  0x12   :  { %s145_s1 = smov 32   ;;  %s146_s2 = smov 2  }
  0x13   :  { %106 = dma.vmem_to_hbm [thread:$0]  %s101_s16, 256, %s229_s3, [#allocation5], %s145_s1, %s145_s1, %s146_s2  }
  0x14   :  { %142 = dma.done.wait [#allocation5], 256  }
  0x15   :  { %143 = vsyncadd [#allocation5], 4294967040 }
  0x16   :  { %110 = vsyncpa [#allocation5], 1 }

</bundles_post_ra>
